<compile_context>
chip_gen: v6e
topology: v6e:2x2x1
jax: 0.10.0
libtpu: 0.0.40
codegen_flags: <defaults>
</compile_context>

<pallas_src>
import functools

import jax
import jax.numpy as jnp
from jax.experimental import pallas as pl
from jax.experimental.pallas import tpu as pltpu


def _vit_embed_kernel(p_ref, w_ref, pos_ref, o_ref):
    # p_ref:   (BI, N+1, Kp) bf16 — row 0 of each image is an all-zero "cls" row
    # w_ref:   (Kp, D)       bf16 flattened conv weight (resident)
    # pos_ref: (N+1, D)      f32  pos table (cls token / conv bias folded in)
    # o_ref:   (BI, N+1, D)  output block
    w = w_ref[...]
    pos = pos_ref[...]
    for i in range(p_ref.shape[0]):            # static unroll over images in tile
        acc = jnp.dot(p_ref[i], w, preferred_element_type=jnp.float32)  # MXU
        o_ref[i] = (acc + pos).astype(o_ref.dtype)                      # VPU add + store


def vit_embeddings(x, conv_w, conv_b, cls_token, pos_embed, patch_size,
                   *, out_dtype=None, target_rows=512):
    """x: (B, C, H, W).  Returns (B, N+1, D) in `out_dtype` (default x.dtype)."""
    B, C, H, W = x.shape
    P = int(patch_size)
    D = conv_w.shape[0]
    nh, nw = H // P, W // P
    N = nh * nw
    S = N + 1                                   # sequence length incl. cls token
    K = C * P * P
    Kp = ((K + 127) // 128) * 128               # pad contraction dim to lane multiple
    if out_dtype is None:
        out_dtype = x.dtype
    out_bytes = jnp.dtype(out_dtype).itemsize

    # --- operand prep (fusible into the pallas_call operand DMA under jit) ----
    # Unfold NCHW -> (B, N, K), channel-major within a patch (matches Conv2d
    # weight layout (D, C, P, P) flattened to (K, D)); prepend one zero row per
    # image (the cls slot) and zero-pad K -> Kp.
    xp = x.reshape(B, C, nh, P, nw, P).transpose(0, 2, 4, 1, 3, 5).reshape(B, N, K)
    patches = jnp.pad(xp, ((0, 0), (1, 0), (0, Kp - K))).astype(jnp.bfloat16)  # (B, S, Kp)

    w_kd = jnp.pad(conv_w.reshape(D, K).T,
                   ((0, Kp - K), (0, 0))).astype(jnp.bfloat16)                  # (Kp, D)

    pos = pos_embed.reshape(S, D).astype(jnp.float32)
    pos_tab = jnp.concatenate(
        [pos[:1] + cls_token.reshape(1, D).astype(jnp.float32),   # row 0: cls + pos[0]
         pos[1:] + conv_b.reshape(1, D).astype(jnp.float32)],     # rows 1..N: pos + bias
        axis=0)                                                   # (S, D) f32 (resident)

    # --- tile choice: BI whole images per grid step ---------------------------
    BI = max(1, min(B, target_rows // S))
    while BI > 1 and B % BI != 0:
        BI -= 1
    if B >= 2 and B // BI < 2:                  # keep >= 2 grid steps (v7x: 2 TCs)
        BI = max(1, B // 2)
        while BI > 1 and B % BI != 0:
            BI -= 1
    grid = (B // BI,)

    # --- VMEM budget (double-buffered in/out blocks + resident weight/pos) ----
    sub = lambda r: ((r + 7) // 8) * 8
    blk_in = BI * sub(S) * Kp * 2
    blk_out = BI * sub(S) * D * out_bytes
    needed = 2 * (blk_in + blk_out) + 2 * (Kp * D * 2) + sub(S) * D * 4
    vmem_limit = int(min(64 * 2**20, max(32 * 2**20, 2 * needed)))

    cost = pl.CostEstimate(
        flops=2 * B * S * Kp * D,
        transcendentals=0,
        bytes_accessed=(B * S * Kp * 2) + (Kp * D * 2) + (S * D * 4) + (B * S * D * out_bytes),
    )

    out = pl.pallas_call(
        _vit_embed_kernel,
        out_shape=jax.ShapeDtypeStruct((B, S, D), out_dtype),
        grid_spec=pl.GridSpec(
            grid=grid,
            in_specs=[
                pl.BlockSpec((BI, S, Kp), lambda g: (g, 0, 0)),   # patch rows (incl. zero cls row)
                pl.BlockSpec((Kp, D), lambda g: (0, 0)),          # weight (resident)
                pl.BlockSpec((S, D), lambda g: (0, 0)),           # pos + cls/bias (resident)
            ],
            out_specs=pl.BlockSpec((BI, S, D), lambda g: (g, 0, 0)),
        ),
        compiler_params=pltpu.CompilerParams(
            dimension_semantics=("parallel",),
            allow_input_fusion=[True, False, False],
            vmem_limit_bytes=vmem_limit,
        ),
        cost_estimate=cost,
    )(patches, w_kd, pos_tab)                                     # (B, S, D)
    return out


def reference(x, conv_w, conv_b, cls_token, pos_embed, patch_size):
    B, C, H, W = x.shape
    P = patch_size
    D = conv_w.shape[0]
    nh, nw = H // P, W // P
    N = nh * nw
    K = C * P * P
    xp = x.reshape(B, C, nh, P, nw, P).transpose(0, 2, 4, 1, 3, 5).reshape(B, N, K)
    proj = xp @ conv_w.reshape(D, K).T + conv_b[None, None, :]
    cls = jnp.broadcast_to(cls_token.reshape(1, 1, D), (B, 1, D))
    tok = jnp.concatenate([cls, proj], axis=1)
    return tok + pos_embed.reshape(1, N + 1, D)


if __name__ == "__main__":
    img_size, patch_size, in_channels, embed_dim = 32, 4, 3, 128
    num_patches = (img_size // patch_size) ** 2  # 64
    B = 2

    key = jax.random.PRNGKey(0)
    k_x, k_w, k_b, k_cls, k_pos = jax.random.split(key, 5)

    x = jax.random.normal(k_x, (B, in_channels, img_size, img_size), jnp.float32)
    # PyTorch inits cls/pos to zeros; use small randoms so the test is non-trivial.
    conv_w = jax.random.normal(
        k_w, (embed_dim, in_channels, patch_size, patch_size), jnp.float32) * 0.02
    conv_b = jax.random.normal(k_b, (embed_dim,), jnp.float32) * 0.02
    cls_token = jax.random.normal(k_cls, (1, 1, embed_dim), jnp.float32) * 0.02
    pos_embed = jax.random.normal(
        k_pos, (1, num_patches + 1, embed_dim), jnp.float32) * 0.02

    ref = reference(x, conv_w, conv_b, cls_token, pos_embed, patch_size)

    # f32 output path (exact module semantics).
    fwd = jax.jit(functools.partial(vit_embeddings, patch_size=patch_size))
    out = jax.block_until_ready(fwd(x, conv_w, conv_b, cls_token, pos_embed))
    assert out.shape == (B, num_patches + 1, embed_dim)
    # bf16 matmul inputs (f32 accumulate) => loosened tolerance vs. pure-f32 ref.
    assert jnp.allclose(out, ref, atol=2e-2, rtol=2e-2), \
        float(jnp.max(jnp.abs(out - ref)))

    # bf16 output path (halves HBM write traffic of this mem-bound kernel).
    fwd_bf16 = jax.jit(functools.partial(
        vit_embeddings, patch_size=patch_size, out_dtype=jnp.bfloat16))
    out_bf16 = jax.block_until_ready(fwd_bf16(x, conv_w, conv_b, cls_token, pos_embed))
    assert out_bf16.dtype == jnp.bfloat16
    assert jnp.allclose(out_bf16.astype(jnp.float32), ref, atol=3e-2, rtol=3e-2), \
        float(jnp.max(jnp.abs(out_bf16.astype(jnp.float32) - ref)))

    print("KERNEL_OK")
</pallas_src>

<mosaic_0001>
module attributes {stable_mosaic.version = 11 : i64} {
  func.func @_vit_embed_kernel(%arg0: i32, %arg1: memref<1x65x128xbf16, #tpu.memory_space<vmem>>, %arg2: memref<128x128xbf16, #tpu.memory_space<vmem>>, %arg3: memref<65x128xf32, #tpu.memory_space<vmem>>, %arg4: memref<1x65x128xf32, #tpu.memory_space<vmem>>) attributes {dimension_semantics = [#tpu.dimension_semantics<parallel>], iteration_bounds = array<i64: 2>, scalar_prefetch = 0 : i64, scratch_operands = 0 : i64, tpu.core_type = #tpu.core_type<tc>, window_params = [{transform_indices = @transform_0, window_bounds = array<i64: 1, 65, 128>}, {pipeline_mode = #tpu.pipeline_mode<synchronous>, transform_indices = @transform_1, window_bounds = array<i64: 128, 128>}, {pipeline_mode = #tpu.pipeline_mode<synchronous>, transform_indices = @transform_2, window_bounds = array<i64: 65, 128>}, {transform_indices = @transform_3, window_bounds = array<i64: 1, 65, 128>}]} {
    %c0 = arith.constant 0 : index
    %c0_0 = arith.constant 0 : index
    %0 = vector.load %arg2[%c0, %c0_0] : memref<128x128xbf16, #tpu.memory_space<vmem>>, vector<128x128xbf16>
    %c0_1 = arith.constant 0 : index
    %c0_2 = arith.constant 0 : index
    %1 = vector.load %arg3[%c0_1, %c0_2] : memref<65x128xf32, #tpu.memory_space<vmem>>, vector<65x128xf32>
    %c0_3 = arith.constant 0 : index
    %c0_4 = arith.constant 0 : index
    %c0_5 = arith.constant 0 : index
    %2 = vector.load %arg1[%c0_3, %c0_4, %c0_5] : memref<1x65x128xbf16, #tpu.memory_space<vmem>>, vector<1x65x128xbf16>
    %3 = vector.shape_cast %2 : vector<1x65x128xbf16> to vector<65x128xbf16>
    %cst = arith.constant dense<0.000000e+00> : vector<65x128xf32>
    %4 = tpu.matmul %3, %0, %cst {dimension_numbers = #tpu.dot_dimension_numbers<[1], [0], [0], [1], [0, 0, 1, 1], [], []>} : vector<65x128xbf16>, vector<128x128xbf16>, vector<65x128xf32> -> vector<65x128xf32>
    %5 = arith.addf %4, %1 : vector<65x128xf32>
    %c0_6 = arith.constant 0 : index
    %c0_7 = arith.constant 0 : index
    %c0_8 = arith.constant 0 : index
    %6 = vector.load %arg4[%c0_6, %c0_7, %c0_8] : memref<1x65x128xf32, #tpu.memory_space<vmem>>, vector<1x65x128xf32>
    %7 = vector.shape_cast %6 : vector<1x65x128xf32> to vector<65x128xf32>
    %8 = vector.shape_cast %5 : vector<65x128xf32> to vector<1x65x128xf32>
    tpu.vector_store %arg4[%c0_6, %c0_7, %c0_8], %8 {strides = array<i32>} : memref<1x65x128xf32, #tpu.memory_space<vmem>>, vector<1x65x128xf32>,
    return
  }
  func.func @transform_0(%arg0: i32) -> (i32, i32, i32) {
    %c0_i32 = arith.constant 0 : i32
    %c0_i32_0 = arith.constant 0 : i32
    %c0_i32_1 = arith.constant 0 : i32
    return %arg0, %c0_i32, %c0_i32_0 : i32, i32, i32
  }
  func.func @transform_1(%arg0: i32) -> (i32, i32) {
    %c0_i32 = arith.constant 0 : i32
    %c0_i32_0 = arith.constant 0 : i32
    %c0_i32_1 = arith.constant 0 : i32
    return %c0_i32, %c0_i32_0 : i32, i32
  }
  func.func @transform_2(%arg0: i32) -> (i32, i32) {
    %c0_i32 = arith.constant 0 : i32
    %c0_i32_0 = arith.constant 0 : i32
    %c0_i32_1 = arith.constant 0 : i32
    return %c0_i32, %c0_i32_0 : i32, i32
  }
  func.func @transform_3(%arg0: i32) -> (i32, i32, i32) {
    %c0_i32 = arith.constant 0 : i32
    %c0_i32_0 = arith.constant 0 : i32
    %c0_i32_1 = arith.constant 0 : i32
    return %arg0, %c0_i32, %c0_i32_0 : i32, i32, i32
  }
}

</mosaic_0001>

<bundles_post_ra>
// kernel: vit_embeddings.2
= control target key start
LH: loop header
LB: loop body
LE: loop exit
PB: predicated region body
PF: predicated region fallthrough
CT: control target
= control target key end

     0   :  { %s828_s17 = smov 0   ;;  %s973_s0 = inlined_call_operand.vmem [shape: bf16[128,128], index: 0, kind: input, shape index: {}]   ;;  %s974_s1 = inlined_call_operand.vmem [shape: f32[65,128], index: 1, kind: input, shape index: {}]   ;;  %s975_s2 = inlined_call_operand.vmem [shape: bf16[2,64,48], index: 2, kind: input, shape index: {}]   ;;  %s976_s3 = inlined_call_operand.<no memory space> [shape: bf16[], index: 3, kind: input, shape index: {}]   ;;  %s977_s4 = inlined_call_operand.vmem [shape: f32[2,65,128], index: 4, kind: output, shape index: {}]  }
   0x1   :  { %v9_v0 = vstv %s976_s3 }
   0x2   :  { %v826_v1 = vunpack.i.l.bf16 %v9_v0 }
   0x3 LB: > { %s666_s18 = sadd.s32 4294967295, %s794_s17   ;;  %p670_p0 = scmp.ge.s32.totalorder %s794_s17, 1  ;;  %s794_s17 = sphi %s828_s17, %s19_s17  }
   0x4   : > { %p144_p1 = scmp.lt.s32.totalorder %s794_s17, 3 }
   0x6   : > { %p145_p2 = pnand %p670_p0, %p144_p1 }
   0x8   : > { %148 = sbr.rel (%p145_p2) target bundleno = 262 (0x106), region = 32 }
   0xd   : > { %v775_v2 = vld [vmem:[%s973_s0 + $0x38] sm:$0xff]   ;;  %v204_v3 = vlaneseq  ;;  %v796_v4 = vmov 0.0   ;;  %v776_v5 = vld [vmem:[%s973_s0 + $0x30] sm:$0xff]   ;;  %p169_p3 = scmp.lt.s32.totalorder %s666_s18, 1  ;;  %vm797_vm0 = vmmov 0   ;;  %v777_v7 = vld [vmem:[%s973_s0 + $0x28] sm:$0xff]  }
   0xe   : > { %712 = vmatprep.subr.bf16.mxu0 %v796_v4  ;;  %748 = vmatprep.subr.bf16.mxu1 %v796_v4  ;;  %vm209_vm2 = vcmask 1046528   ;;  %v778_v16 = vld [vmem:[%s973_s0 + $0x20] sm:$0xff]   ;;  %v779_v32 = vld [vmem:[%s973_s0 + $0x18] sm:$0xff]   ;;  %v780_v47 = vld [vmem:[%s973_s0 + $0x10] sm:$0xff]  }
   0xf   : > { %713 = vmatpush3.bf16.msra.mxu0 %v775_v2  ;;  %756 = vmatpush3.bf16.msra.mxu1 %v775_v2  ;;  %s979_s18 = smov (!%p169_p3, %s666_s18), 1  ;;  %v205_v6 = vand.u32 127, %v204_v3  ;;  %v781_v58 = vld [vmem:[%s973_s0 + $0x8] sm:$0xff]   ;;  %v782_v59 = vld [vmem:[%s973_s0] sm:$0xff]   ;;  %v429_v3 = vld [vmem:[%s974_s1 + $0x30] sm:$0xff] }
  0x10   : > { %714 = vmatprep.subr.bf16.mxu0 %v796_v4  ;;  %749 = vmatprep.subr.bf16.mxu1 %v796_v4  ;;  %s698_s24 = sshll.u32 %s979_s18, 5  ;;  %s764_s12 = smul.u32 72, %s979_s18  ;;  %v423_v2 = vld [vmem:[%s974_s1] sm:$0xff] }
  0x11   : > { %728 = vmatprep.mubr.msk.bf16.mxu0 %vm797_vm0, %v796_v4  ;;  %740 = vmatprep.mubr.msk.bf16.mxu1 %vm797_vm0, %v796_v4  ;;  %s631_s27 = scalar_lea.vmem %s975_s2, %s698_s24  ;;  %vm207_vm1 = vcmp.lt.s32.totalorder %v205_v6, 48 }
  0x12   : > { %v675_v8 = vld [vmem:[%s631_s27] sm:$0xff]   ;;  %v680_v9 = vld [vmem:[%s631_s27 + $0x14] sm:$0xff]   ;;  %v682_v10 = vld [vmem:[%s631_s27 + $0x10] ss:$12 sps:$4 sm:$0xff]   ;;  %s938_s3 = scalar_lea.vmem %s977_s4, %s764_s12 }
  0x13   : > { %715 = vmatpush3.bf16.msra.mxu0 %v776_v5  ;;  %757 = vmatpush3.bf16.msra.mxu1 %v776_v5  ;;  %v202_v11 = vunpack.c.l.bf16 %v675_v8  ;;  %v227_v12 = vunpack.c.h.bf16 %v675_v8  ;;  %v331_v13 = vunpack.c.l.bf16 %v680_v9  ;;  %v357_v14 = vunpack.c.h.bf16 %v680_v9  ;;  %v677_v15 = vld [vmem:[%s631_s27 + $0x8] sm:$0xff]  }
  0x14   : > { %716 = vmatprep.subr.bf16.mxu0 %v796_v4  ;;  %750 = vmatprep.subr.bf16.mxu1 %v796_v4  ;;  %v383_v17 = vunpack.c.h.bf16 %v682_v10  ;;  %v253_v18 = vunpack.c.l.bf16 %v677_v15  ;;  %v279_v19 = vunpack.c.h.bf16 %v677_v15  ;;  %v305_v23 = vunpack.c.l.bf16 %v682_v10  ;;  %v424_v9 = vld [vmem:[%s974_s1 + $0x8] sm:$0xff] }
  0x15   : > { %v208_v20 = vsel %vm207_vm1, %v202_v11, %v826_v1  ;;  %v233_v21 = vsel %vm207_vm1, %v227_v12, %v826_v1  ;;  %v337_v22 = vsel %vm207_vm1, %v331_v13, %v826_v1  ;;  %v363_v26 = vsel %vm207_vm1, %v357_v14, %v826_v1  ;;  %v430_v11 = vld [vmem:[%s974_s1 + $0x38] sm:$0xff] }
  0x16   : > { %v210_v24 = vsel %vm209_vm2, %v208_v20, %v826_v1  ;;  %v235_v25 = vsel %vm209_vm2, %v233_v21, %v208_v20  ;;  %v389_v27 = vsel %vm207_vm1, %v383_v17, %v826_v1  ;;  %v365_v30 = vsel %vm209_vm2, %v363_v26, %v337_v22  ;;  %v425_v17 = vld [vmem:[%s974_s1 + $0x10] sm:$0xff] }
  0x17   : > { %717 = vmatpush3.bf16.msra.mxu0 %v777_v7  ;;  %758 = vmatpush3.bf16.msra.mxu1 %v777_v7  ;;  %v211_v28 = vrot.slane %v210_v24, 7  ;;  %v236_v29 = vrot.slane %v235_v25, 7  ;;  %v391_v31 = vsel %vm209_vm2, %v389_v27, %v363_v26  ;;  %v366_v33 = vrot.slane %v365_v30, 7  ;;  %v426_v25 = vld [vmem:[%s974_s1 + $0x18] sm:$0xff] }
  0x18   : > { %718 = vmatprep.subr.bf16.mxu0 %v796_v4  ;;  %751 = vmatprep.subr.bf16.mxu1 %v796_v4  ;;  %v392_v34 = vrot.slane %v391_v31, 7  ;;  %v259_v35 = vsel %vm207_vm1, %v253_v18, %v826_v1  ;;  %v285_v36 = vsel %vm207_vm1, %v279_v19, %v826_v1  ;;  %v399_v45 = vsel %vm209_vm2, %v826_v1, %v389_v27  ;;  %v431_v19 = vld [vmem:[%s974_s1 + $0x40] sm:$0x1] }
  0x19   : > { %v212_v37 = vpack.c.bf16 %v796_v4, %v211_v28  ;;  %v238_v38 = vpack.c.bf16 %v796_v4, %v236_v29  ;;  %v261_v39 = vsel %vm209_vm2, %v259_v35, %v233_v21  ;;  %v368_v40 = vpack.c.bf16 %v796_v4, %v366_v33  ;;  %v427_v31 = vld [vmem:[%s974_s1 + $0x20] sm:$0xff] }
  0x1a   : > { %v394_v41 = vpack.c.bf16 %v796_v4, %v392_v34  ;;  %v262_v42 = vrot.slane %v261_v39, 7  ;;  %v287_v43 = vsel %vm209_vm2, %v285_v36, %v259_v35  ;;  %v311_v46 = vsel %vm207_vm1, %v305_v23, %v826_v1 }
  0x1b   : > { %719 = vmatpush3.bf16.msra.mxu0 %v778_v16  ;;  %759 = vmatpush3.bf16.msra.mxu1 %v778_v16  ;;  %215 = vst [vmem:[#allocation7] sm:$0xf] %v212_v37  ;;  %241 = vst [vmem:[#allocation7 + $0x4] sm:$0xf] %v238_v38  ;;  %v288_v44 = vrot.slane %v287_v43, 7  ;;  %v400_v49 = vrot.slane %v399_v45, 7  ;;  %v313_v50 = vsel %vm209_vm2, %v311_v46, %v285_v36 }
  0x1c   : > { %720 = vmatprep.subr.bf16.mxu0 %v796_v4  ;;  %752 = vmatprep.subr.bf16.mxu1 %v796_v4  ;;  %371 = vst [vmem:[#allocation7 + $0x18] sm:$0xf] %v368_v40  ;;  %397 = vst [vmem:[#allocation7 + $0x1c] sm:$0xf] %v394_v41  ;;  %v264_v48 = vpack.c.bf16 %v796_v4, %v262_v42  ;;  %v339_v51 = vsel %vm209_vm2, %v337_v22, %v311_v46  ;;  %v314_v53 = vrot.slane %v313_v50, 7  ;;  %v428_v36 = vld [vmem:[%s974_s1 + $0x28] sm:$0xff] }
  0x1d   : > { %v290_v52 = vpack.c.bf16 %v796_v4, %v288_v44  ;;  %v340_v54 = vrot.slane %v339_v51, 7  ;;  %v402_v55 = vpack.c.bf16 %v796_v4, %v400_v49 }
  0x1e   : > { %267 = vst [vmem:[#allocation7 + $0x8] sm:$0xf] %v264_v48  ;;  %v316_v56 = vpack.c.bf16 %v796_v4, %v314_v53 }
  0x1f   : > { %721 = vmatpush3.bf16.msra.mxu0 %v779_v32  ;;  %760 = vmatpush3.bf16.msra.mxu1 %v779_v32  ;;  %293 = vst [vmem:[#allocation7 + $0xc] sm:$0xf] %v290_v52  ;;  %v342_v57 = vpack.c.bf16 %v796_v4, %v340_v54  ;;  %405 = vst [vmem:[#allocation7 + $0x20] sm:$0xf] %v402_v55 }
  0x20   : > { %722 = vmatprep.subr.bf16.mxu0 %v796_v4  ;;  %753 = vmatprep.subr.bf16.mxu1 %v796_v4  ;;  %319 = vst [vmem:[#allocation7 + $0x10] sm:$0xf] %v316_v56 }
  0x21   : > { %345 = vst [vmem:[#allocation7 + $0x14] sm:$0xf] %v342_v57 }
  0x22   : > { %v783_v60 = vld [vmem:[#allocation7] sm:$0xff]  }
  0x23   : > { %723 = vmatpush3.bf16.msra.mxu0 %v780_v47  ;;  %761 = vmatpush3.bf16.msra.mxu1 %v780_v47  ;;  %v784_v61 = vld [vmem:[#allocation7 + $0x18] sm:$0xff]  }
  0x24   : > { %724 = vmatprep.subr.bf16.mxu0 %v796_v4  ;;  %754 = vmatprep.subr.bf16.mxu1 %v796_v4 }
  0x26   : > { %v785_v62 = vld [vmem:[#allocation7 + $0x8] sm:$0xff]   ;;  %v786_v63 = vld [vmem:[#allocation7 + $0x20] ss:$0 sps:$4 sm:$0x11]  }
  0x27   : > { %725 = vmatpush3.bf16.msra.mxu0 %v781_v58  ;;  %762 = vmatpush3.bf16.msra.mxu1 %v781_v58 }
  0x28   : > { %726 = vmatprep.subr.bf16.mxu0 %v796_v4  ;;  %755 = vmatprep.subr.bf16.mxu1 %v796_v4  ;;  %v787_v0 = vld [vmem:[#allocation7 + $0x10] sm:$0xff]  }
  0x2b   : > { %727 = vmatpush3.bf16.msra.mxu0 %v782_v59  ;;  %763 = vmatpush3.bf16.msra.mxu1 %v782_v59 }
  0x2e   : > { %729 = vmatmul.mubr.bf16.vlgmr.msra.gmra.mxu0 %v783_v60  ;;  %741 = vmatmul.mubr.bf16.vlgmr.msra.gmra.mxu1 %v784_v61 }
  0x2f   : > { %732 = vmatprep.mubr.msk.bf16.mxu0 %vm797_vm0, %v796_v4  ;;  %744 = vmatprep.mubr.msk.bf16.mxu1 %vm797_vm0, %v796_v4 }
  0x36   : > { %733 = vmatmul.mubr.bf16.gmra.mxu0 %v785_v62  ;;  %745 = vmatmul.mubr.bf16.gmra.mxu1 %v786_v63 }
  0x37   : > { %736 = vmatprep.mubr.msk.bf16.mxu0 %vm797_vm0, %v796_v4 }
  0x3e   : > { %737 = vmatmul.mubr.bf16.gmra.mxu0 %v787_v0 }
  0xee   : > { %v551_v5 = vpop.f32.mrf.mxu0  ;;  %v575_v4 = vpop.f32.mrf.mxu1 }
  0xef   : > { %v552_v6 = vadd.f32 %v551_v5, %v423_v2  ;;  %v576_v7 = vadd.f32 %v575_v4, %v429_v3 }
  0xf0   : > { %v730_v8 = vpop.f32.mrf.mxu0  ;;  %v742_v10 = vpop.f32.mrf.mxu1 }
  0xf1   : > { %589 = vst [vmem:[%s938_s3] sm:$0xff] %v552_v6  ;;  %595 = vst [vmem:[%s938_s3 + $0x30] sm:$0xff] %v576_v7 }
  0xf2   : > { %v554_v12 = vpop.f32.mrf.mxu0  ;;  %v578_v13 = vpop.f32.mrf.mxu1 }
  0xf3   : > { %v555_v14 = vadd.f32 %v554_v12, %v424_v9  ;;  %v579_v15 = vadd.f32 %v578_v13, %v430_v11 }
  0xf4   : > { %v731_v16 = vpop.f32.mrf.mxu0  ;;  %v743_v18 = vpop.f32.mrf.mxu1 }
  0xf5   : > { %590 = vst [vmem:[%s938_s3 + $0x8] sm:$0xff] %v555_v14  ;;  %596 = vst [vmem:[%s938_s3 + $0x38] sm:$0xff] %v579_v15 }
  0xf6   : > { %v559_v20 = vpop.f32.mrf.mxu0  ;;  %v583_v21 = vpop.f32.mrf.mxu1 }
  0xf7   : > { %v560_v22 = vadd.f32 %v559_v20, %v425_v17  ;;  %v584_v23 = vadd.f32 %v583_v21, %v431_v19 }
  0xf8   : > { %v734_v24 = vpop.f32.mrf.mxu0  ;;  %v746_v26 = vpop.f32.mrf.mxu1 }
  0xf9   : > { %591 = vst [vmem:[%s938_s3 + $0x10] sm:$0xff] %v560_v22  ;;  %597 = vst [vmem:[%s938_s3 + $0x40] sm:$0x1] %v584_v23 }
  0xfa   : > { %v562_v27 = vpop.f32.mrf.mxu0  ;;  %v586_v28 = vpop.f32.mrf.mxu1 }
  0xfb   : > { %v563_v29 = vadd.f32 %v562_v27, %v426_v25 }
  0xfc   : > { %v735_v30 = vpop.f32.mrf.mxu0  ;;  %v747_v32 = vpop.f32.mrf.mxu1 }
  0xfd   : > { %592 = vst [vmem:[%s938_s3 + $0x18] sm:$0xff] %v563_v29 }
  0xfe   : > { %v567_v33 = vpop.f32.mrf.mxu0 }
  0xff   : > { %v568_v34 = vadd.f32 %v567_v33, %v427_v31 }
 0x100   : > { %v738_v35 = vpop.f32.mrf.mxu0 }
 0x101   : > { %593 = vst [vmem:[%s938_s3 + $0x20] sm:$0xff] %v568_v34 }
 0x102   : > { %v570_v37 = vpop.f32.mrf.mxu0 }
 0x103   : > { %v571_v38 = vadd.f32 %v570_v37, %v428_v36 }
 0x104   : > { %v739_v39 = vpop.f32.mrf.mxu0 }
 0x105   : > { %594 = vst [vmem:[%s938_s3 + $0x28] sm:$0xff] %v571_v38 }
 0x106 PF: > { %s19_s17 = sadd.s32 1, %s794_s17  }
 0x107   : > { %p16_p4 = scmp.ge.s32.totalorder %s19_s17, 4  }
 0x109   :  { %18 = sbr.rel (!%p16_p4) target bundleno = 3 (0x3), region = 78 }

</bundles_post_ra>
